<compile_context>
chip_gen: v7x
topology: tpu7x:2x2x1
jax: 0.10.0
libtpu: 0.0.40
codegen_flags: <defaults>
</compile_context>

<pallas_src>
import functools

import jax
import jax.numpy as jnp
from jax.experimental import pallas as pl
from jax.experimental.pallas import tpu as pltpu


def _round_up(v, m):
    return (v + m - 1) // m * m


def dlow_head_kernel(x_ref, w1_ref, b1_ref, w2_ref, b2_ref, wh_ref, bh_ref,
                     out_ref, *, out_dim):
    """One row-tile of the DLow q-net.

    Weights arrive pre-transposed ([in, out]); the head weight is the fused
    [A | b | z | A] construction, so the elementwise tail is a single lane
    select + log (EUP) on the last out_dim lanes.
    """
    # q_mlp: two Linear + ReLU layers, f32 accumulation on the MXU.
    h = jnp.dot(x_ref[...], w1_ref[...],
                preferred_element_type=jnp.float32) + b1_ref[...]
    h = jnp.maximum(h, 0.0).astype(w2_ref.dtype)
    h = jnp.dot(h, w2_ref[...],
                preferred_element_type=jnp.float32) + b2_ref[...]
    h = jnp.maximum(h, 0.0).astype(wh_ref.dtype)

    # Fused head -> packed [A | b | z | A] tile (>=128 lanes, lane-dense).
    y = jnp.dot(h, wh_ref[...],
                preferred_element_type=jnp.float32) + bh_ref[...]

    # Lanes [3*out_dim, 4*out_dim) hold A again; rewrite them as logvar.
    lane = jax.lax.broadcasted_iota(jnp.int32, y.shape, 1)
    is_logvar = (lane >= 3 * out_dim) & (lane < 4 * out_dim)
    out_ref[...] = jnp.where(is_logvar, jnp.log(y * y + 1e-8), y)


def prepare_static_params(params):
    """One-time host prep (run at checkpoint-load time, NOT per forward call):
    transpose PyTorch-layout [out, in] Linear weights to MXU-friendly [in, out]."""
    w1, b1, w2, b2, wA, bA, wB, bB = params
    return {
        "w1t": jnp.asarray(w1.T), "b1": jnp.asarray(b1),
        "w2t": jnp.asarray(w2.T), "b2": jnp.asarray(b2),
        "wAt": jnp.asarray(wA.T), "bA": jnp.asarray(bA),
        "wBt": jnp.asarray(wB.T), "bB": jnp.asarray(bB),
    }


@functools.partial(jax.jit,
                   static_argnames=("nk", "nz", "row_tile", "matmul_dtype"))
def dlow_head(x, eps_shared, sp, *, nk, nz, row_tile=512,
              matmul_dtype=jnp.float32):
    """x: [N, D] agent_context.  eps_shared: [1, nz] shared noise.
    sp: output of prepare_static_params.  Returns (A, mu_b, z, logvar),
    each [N*nk, nz] in f32."""
    N, D = x.shape
    out_dim = nk * nz
    H1 = sp["w1t"].shape[1]
    H2 = sp["w2t"].shape[1]

    # --- per-call head build (small: [H2, 4*out_dim]; depends on eps) -------
    # eps.repeat((N*nk,1)) followed by the .view(-1, nz) of A/b is, in packed
    # [N, nk*nz] layout, eps tiled along the feature axis.
    eps_packed = jnp.tile(eps_shared, (1, nk))                    # [1, nk*nz]
    wz = sp["wAt"] * eps_packed + sp["wBt"]                       # z fold
    bz = sp["bA"] * eps_packed + sp["bB"]
    wh = jnp.concatenate([sp["wAt"], sp["wBt"], wz, sp["wAt"]], axis=1)
    bh = jnp.concatenate([sp["bA"], sp["bB"], bz, sp["bA"]], axis=1)

    out_w = 4 * out_dim
    OUT_W = _round_up(out_w, 128)          # lane-dense, unmasked stores
    if OUT_W != out_w:
        wh = jnp.pad(wh, ((0, 0), (0, OUT_W - out_w)))
        bh = jnp.pad(bh, ((0, 0), (0, OUT_W - out_w)))

    # --- row tiling ----------------------------------------------------------
    tm = min(_round_up(row_tile, 8), _round_up(N, 8))
    if N >= 512:
        # Ensure >=2 grid steps so ("parallel",) shards rows across both
        # TensorCores on v7x.
        tm = min(tm, _round_up(pl.cdiv(N, 2), 8))
    grid = (pl.cdiv(N, tm),)

    xm  = x.astype(matmul_dtype)
    w1t = sp["w1t"].astype(matmul_dtype)
    w2t = sp["w2t"].astype(matmul_dtype)
    whm = wh.astype(matmul_dtype)

    def resident(shape):
        return pl.BlockSpec(shape, lambda i: (0,) * len(shape))

    packed = pl.pallas_call(
        functools.partial(dlow_head_kernel, out_dim=out_dim),
        grid=grid,
        in_specs=[
            pl.BlockSpec((tm, D), lambda i: (i, 0)),   # x row tile (D unpadded)
            resident((D, H1)), resident((1, H1)),      # w1 / b1 (resident)
            resident((H1, H2)), resident((1, H2)),     # w2 / b2
            resident((H2, OUT_W)),                     # fused [A|b|z|A] head W
            resident((1, OUT_W)),                      # fused head bias
        ],
        out_specs=pl.BlockSpec((tm, OUT_W), lambda i: (i, 0)),
        out_shape=jax.ShapeDtypeStruct((N, OUT_W), jnp.float32),
        compiler_params=pltpu.CompilerParams(
            dimension_semantics=("parallel",)),
    )(xm, w1t, sp["b1"], w2t, sp["b2"], whm, bh)

    # These slices fuse into the same jit (no extra packed-array round trip);
    # downstream could also consume the packed layout directly.
    A      = packed[:, 0 * out_dim:1 * out_dim].reshape(-1, nz)
    mu_b   = packed[:, 1 * out_dim:2 * out_dim].reshape(-1, nz)
    z      = packed[:, 2 * out_dim:3 * out_dim].reshape(-1, nz)
    logvar = packed[:, 3 * out_dim:4 * out_dim].reshape(-1, nz)
    return A, mu_b, z, logvar


def init_params(key, d_model, qnet_mlp, nk, nz):
    """Deterministic synthetic init of q_mlp / q_A / q_b (PyTorch Linear shapes)."""
    h1, h2 = qnet_mlp
    dims = [(h1, d_model), (h2, h1), (nk * nz, h2), (nk * nz, h2)]
    keys = jax.random.split(key, 2 * len(dims))
    params = []
    for i, (dout, din) in enumerate(dims):
        scale = 1.0 / jnp.sqrt(jnp.float32(din))
        w = jax.random.uniform(keys[2 * i], (dout, din), jnp.float32, -scale, scale)
        b = jax.random.uniform(keys[2 * i + 1], (1, dout), jnp.float32, -scale, scale)
        params += [w, b]
    return tuple(params)


def reference(x, params, eps_shared, *, nk, nz):
    """Pure-JAX reference of the same math, for a sanity check."""
    w1, b1, w2, b2, wA, bA, wB, bB = params
    h = jnp.maximum(x @ w1.T + b1, 0.0)
    h = jnp.maximum(h @ w2.T + b2, 0.0)
    A = (h @ wA.T + bA).reshape(-1, nz)
    b = (h @ wB.T + bB).reshape(-1, nz)
    N = x.shape[0]
    eps = jnp.tile(eps_shared, (N * nk, 1))
    z = A * eps + b
    logvar = jnp.log(A ** 2 + 1e-8)
    return A, b, z, logvar


if __name__ == "__main__":
    # Small, forward-consistent shapes:
    #   agent_num N = 8, pred_model_dim D = 32, qnet_mlp = [64, 32],
    #   sample_k nk = 4, nz = 8  -> q_A/q_b output dim nk*nz = 32,
    #   packed kernel output width = 4*nk*nz = 128 lanes.
    N, D = 8, 32
    qnet_mlp = [64, 32]
    nk, nz = 4, 8

    key = jax.random.PRNGKey(0)
    k_x, k_eps, k_p = jax.random.split(key, 3)

    agent_context = jax.random.normal(k_x, (N, D), jnp.float32)
    eps_shared = jax.random.normal(k_eps, (1, nz), jnp.float32)  # share_eps=True
    params = init_params(k_p, D, qnet_mlp, nk, nz)

    # One-time prep (model-load time), hoisted out of the per-call path.
    static_params = prepare_static_params(params)

    A, mu_b, z, logvar = dlow_head(agent_context, eps_shared, static_params,
                                   nk=nk, nz=nz)
    jax.block_until_ready((A, mu_b, z, logvar))

    A_r, b_r, z_r, lv_r = reference(agent_context, params, eps_shared, nk=nk, nz=nz)
    assert jnp.allclose(A, A_r, atol=1e-4)
    assert jnp.allclose(mu_b, b_r, atol=1e-4)
    assert jnp.allclose(z, z_r, atol=1e-4)
    assert jnp.allclose(logvar, lv_r, atol=1e-4)
    assert z.shape == (N * nk, nz)

    print("KERNEL_OK")
</pallas_src>

<mosaic_0001>
module attributes {stable_mosaic.version = 11 : i64} {
  func.func @dlow_head_kernel(%arg0: i32, %arg1: memref<8x32xf32, #tpu.memory_space<vmem>>, %arg2: memref<32x64xf32, #tpu.memory_space<vmem>>, %arg3: memref<1x64xf32, #tpu.memory_space<vmem>>, %arg4: memref<64x32xf32, #tpu.memory_space<vmem>>, %arg5: memref<1x32xf32, #tpu.memory_space<vmem>>, %arg6: memref<32x128xf32, #tpu.memory_space<vmem>>, %arg7: memref<1x128xf32, #tpu.memory_space<vmem>>, %arg8: memref<8x128xf32, #tpu.memory_space<vmem>>) attributes {dimension_semantics = [#tpu.dimension_semantics<parallel>], iteration_bounds = array<i64: 1>, scalar_prefetch = 0 : i64, scratch_operands = 0 : i64, tpu.core_type = #tpu.core_type<tc>, window_params = [{transform_indices = @transform_0, window_bounds = array<i64: 8, 32>}, {pipeline_mode = #tpu.pipeline_mode<synchronous>, transform_indices = @transform_1, window_bounds = array<i64: 32, 64>}, {pipeline_mode = #tpu.pipeline_mode<synchronous>, transform_indices = @transform_2, window_bounds = array<i64: 1, 64>}, {pipeline_mode = #tpu.pipeline_mode<synchronous>, transform_indices = @transform_3, window_bounds = array<i64: 64, 32>}, {pipeline_mode = #tpu.pipeline_mode<synchronous>, transform_indices = @transform_4, window_bounds = array<i64: 1, 32>}, {pipeline_mode = #tpu.pipeline_mode<synchronous>, transform_indices = @transform_5, window_bounds = array<i64: 32, 128>}, {pipeline_mode = #tpu.pipeline_mode<synchronous>, transform_indices = @transform_6, window_bounds = array<i64: 1, 128>}, {transform_indices = @transform_7, window_bounds = array<i64: 8, 128>}]} {
    %c0 = arith.constant 0 : index
    %c0_0 = arith.constant 0 : index
    %0 = vector.load %arg1[%c0, %c0_0] : memref<8x32xf32, #tpu.memory_space<vmem>>, vector<8x32xf32>
    %c0_1 = arith.constant 0 : index
    %c0_2 = arith.constant 0 : index
    %1 = vector.load %arg2[%c0_1, %c0_2] : memref<32x64xf32, #tpu.memory_space<vmem>>, vector<32x64xf32>
    %cst = arith.constant dense<0.000000e+00> : vector<8x64xf32>
    %2 = tpu.matmul %0, %1, %cst {dimension_numbers = #tpu.dot_dimension_numbers<[1], [0], [0], [1], [0, 0, 1, 1], [], []>} : vector<8x32xf32>, vector<32x64xf32>, vector<8x64xf32> -> vector<8x64xf32>
    %c0_3 = arith.constant 0 : index
    %c0_4 = arith.constant 0 : index
    %3 = vector.load %arg3[%c0_3, %c0_4] : memref<1x64xf32, #tpu.memory_space<vmem>>, vector<1x64xf32>
    %4 = vector.broadcast %3 : vector<1x64xf32> to vector<8x64xf32>
    %5 = arith.addf %2, %4 : vector<8x64xf32>
    %cst_5 = arith.constant 0.000000e+00 : f32
    %6 = vector.broadcast %cst_5 : f32 to vector<8x64xf32>
    %7 = arith.maximumf %5, %6 : vector<8x64xf32>
    %c0_6 = arith.constant 0 : index
    %c0_7 = arith.constant 0 : index
    %8 = vector.load %arg4[%c0_6, %c0_7] : memref<64x32xf32, #tpu.memory_space<vmem>>, vector<64x32xf32>
    %cst_8 = arith.constant dense<0.000000e+00> : vector<8x32xf32>
    %9 = tpu.matmul %7, %8, %cst_8 {dimension_numbers = #tpu.dot_dimension_numbers<[1], [0], [0], [1], [0, 0, 1, 1], [], []>} : vector<8x64xf32>, vector<64x32xf32>, vector<8x32xf32> -> vector<8x32xf32>
    %c0_9 = arith.constant 0 : index
    %c0_10 = arith.constant 0 : index
    %10 = vector.load %arg5[%c0_9, %c0_10] : memref<1x32xf32, #tpu.memory_space<vmem>>, vector<1x32xf32>
    %11 = vector.broadcast %10 : vector<1x32xf32> to vector<8x32xf32>
    %12 = arith.addf %9, %11 : vector<8x32xf32>
    %cst_11 = arith.constant 0.000000e+00 : f32
    %13 = vector.broadcast %cst_11 : f32 to vector<8x32xf32>
    %14 = arith.maximumf %12, %13 : vector<8x32xf32>
    %c0_12 = arith.constant 0 : index
    %c0_13 = arith.constant 0 : index
    %15 = vector.load %arg6[%c0_12, %c0_13] : memref<32x128xf32, #tpu.memory_space<vmem>>, vector<32x128xf32>
    %cst_14 = arith.constant dense<0.000000e+00> : vector<8x128xf32>
    %16 = tpu.matmul %14, %15, %cst_14 {dimension_numbers = #tpu.dot_dimension_numbers<[1], [0], [0], [1], [0, 0, 1, 1], [], []>} : vector<8x32xf32>, vector<32x128xf32>, vector<8x128xf32> -> vector<8x128xf32>
    %c0_15 = arith.constant 0 : index
    %c0_16 = arith.constant 0 : index
    %17 = vector.load %arg7[%c0_15, %c0_16] : memref<1x128xf32, #tpu.memory_space<vmem>>, vector<1x128xf32>
    %18 = vector.broadcast %17 : vector<1x128xf32> to vector<8x128xf32>
    %19 = arith.addf %16, %18 : vector<8x128xf32>
    %20 = tpu.iota {dimensions = array<i32: 1>} : vector<8x128xi32>
    %c96_i32 = arith.constant 96 : i32
    %21 = vector.broadcast %c96_i32 : i32 to vector<8x128xi32>
    %22 = arith.cmpi sge, %20, %21 : vector<8x128xi32>
    %c128_i32 = arith.constant 128 : i32
    %23 = vector.broadcast %c128_i32 : i32 to vector<8x128xi32>
    %24 = arith.cmpi slt, %20, %23 : vector<8x128xi32>
    %25 = arith.andi %22, %24 : vector<8x128xi1>
    %26 = arith.mulf %19, %19 : vector<8x128xf32>
    %cst_17 = arith.constant 9.99999993E-9 : f32
    %27 = vector.broadcast %cst_17 : f32 to vector<8x128xf32>
    %28 = arith.addf %26, %27 : vector<8x128xf32>
    %29 = math.log %28 : vector<8x128xf32>
    %30 = arith.select %25, %29, %19 : vector<8x128xi1>, vector<8x128xf32>
    %c0_18 = arith.constant 0 : index
    %c0_19 = arith.constant 0 : index
    %31 = vector.load %arg8[%c0_18, %c0_19] : memref<8x128xf32, #tpu.memory_space<vmem>>, vector<8x128xf32>
    tpu.vector_store %arg8[%c0_18, %c0_19], %30 {strides = array<i32>} : memref<8x128xf32, #tpu.memory_space<vmem>>, vector<8x128xf32>,
    return
  }
  func.func @transform_0(%arg0: i32) -> (i32, i32) {
    %c0_i32 = arith.constant 0 : i32
    %c0_i32_0 = arith.constant 0 : i32
    return %arg0, %c0_i32 : i32, i32
  }
  func.func @transform_1(%arg0: i32) -> (i32, i32) {
    %c0_i32 = arith.constant 0 : i32
    %c0_i32_0 = arith.constant 0 : i32
    %c0_i32_1 = arith.constant 0 : i32
    return %c0_i32, %c0_i32_0 : i32, i32
  }
  func.func @transform_2(%arg0: i32) -> (i32, i32) {
    %c0_i32 = arith.constant 0 : i32
    %c0_i32_0 = arith.constant 0 : i32
    %c0_i32_1 = arith.constant 0 : i32
    return %c0_i32, %c0_i32_0 : i32, i32
  }
  func.func @transform_3(%arg0: i32) -> (i32, i32) {
    %c0_i32 = arith.constant 0 : i32
    %c0_i32_0 = arith.constant 0 : i32
    %c0_i32_1 = arith.constant 0 : i32
    return %c0_i32, %c0_i32_0 : i32, i32
  }
  func.func @transform_4(%arg0: i32) -> (i32, i32) {
    %c0_i32 = arith.constant 0 : i32
    %c0_i32_0 = arith.constant 0 : i32
    %c0_i32_1 = arith.constant 0 : i32
    return %c0_i32, %c0_i32_0 : i32, i32
  }
  func.func @transform_5(%arg0: i32) -> (i32, i32) {
    %c0_i32 = arith.constant 0 : i32
    %c0_i32_0 = arith.constant 0 : i32
    %c0_i32_1 = arith.constant 0 : i32
    return %c0_i32, %c0_i32_0 : i32, i32
  }
  func.func @transform_6(%arg0: i32) -> (i32, i32) {
    %c0_i32 = arith.constant 0 : i32
    %c0_i32_0 = arith.constant 0 : i32
    %c0_i32_1 = arith.constant 0 : i32
    return %c0_i32, %c0_i32_0 : i32, i32
  }
  func.func @transform_7(%arg0: i32) -> (i32, i32) {
    %c0_i32 = arith.constant 0 : i32
    %c0_i32_0 = arith.constant 0 : i32
    return %arg0, %c0_i32 : i32, i32
  }
}

</mosaic_0001>

<bundles_post_ra>
// kernel: dlow_head.1
= control target key start
LH: loop header
LB: loop body
LE: loop exit
PB: predicated region body
PF: predicated region fallthrough
CT: control target
= control target key end

     0   :  { %v397_v0 = vmov 0.0|0.0   ;;  %vm398_vm0 = vmmov 0   ;;  %v399_v4 = vmov 0.0   ;;  %vm38_vm1 = vcmask 261120   ;;  %s508_s1 = inlined_call_operand.vmem [shape: f32[32,64], index: 1, kind: input, shape index: {}]   ;;  %s509_s3 = inlined_call_operand.vmem [shape: f32[64,32], index: 3, kind: input, shape index: {}]   ;;  %s510_s0 = inlined_call_operand.vmem [shape: f32[8,32], index: 0, kind: input, shape index: {}]   ;;  %s511_s5 = inlined_call_operand.vmem [shape: f32[32,128], index: 5, kind: input, shape index: {}]   ;;  %s512_s2 = inlined_call_operand.vmem [shape: f32[1,64], index: 2, kind: input, shape index: {}]   ;;  %s513_s4 = inlined_call_operand.vmem [shape: f32[1,32], index: 4, kind: input, shape index: {}]   ;;  %s514_s6 = inlined_call_operand.vmem [shape: f32[1,128], index: 6, kind: input, shape index: {}]   ;;  %s515_s7 = inlined_call_operand.vmem [shape: f32[8,128], index: 7, kind: output, shape index: {}]  }
   0x1   :  { %368 = vmatprep.subr.bf16.mxu0 %v397_v0  ;;  %v27_v1 = vld [vmem:[%s508_s1] sm:$0xff]  ;;  %v28_v2 = vld [vmem:[%s508_s1 + $0x8] sm:$0xff]  ;;  %v29_v3 = vld [vmem:[%s508_s1 + $0x10] sm:$0xff]  ;;  %335 = vmatprep.mubr.msk.f32.mxu0 %vm398_vm0, %v399_v4  ;;  %vm128_vm2 = vcmask 523264   ;;  %v287_v43 = vlaneseq }
   0x2   :  { %v369_v5 = vpack.c.bf16 %v28_v2, %v27_v1  ;;  %v30_v6 = vld [vmem:[%s508_s1 + $0x18] sm:$0xff]  ;;  %374 = vmatprep.subr.bf16.mxu1 %v397_v0  ;;  %v113_v7 = vld [vmem:[%s509_s3] sm:$0xff]  ;;  %354 = vmatprep.mubr.msk.f32.mxu1 %vm398_vm0, %v399_v4  ;;  %v114_v8 = vld [vmem:[%s509_s3 + $0x8] sm:$0xff] }
   0x3   :  { %v115_v9 = vld [vmem:[%s509_s3 + $0x10] sm:$0xff]  ;;  %v116_v10 = vld [vmem:[%s509_s3 + $0x18] sm:$0xff]  ;;  %v372_v11 = vpack.c.bf16 %v30_v6, %v29_v3  ;;  %v375_v12 = vpack.c.bf16 %v114_v8, %v113_v7  ;;  %v117_v14 = vld [vmem:[%s509_s3 + $0x20] sm:$0xff]  ;;  %v288_v44 = vand.u32 127, %v287_v43 }
   0x4   :  { %370 = vmatpush3.bf16.msra.mxu0 %v369_v5  ;;  %v378_v13 = vpack.c.bf16 %v116_v10, %v115_v9  ;;  %v118_v15 = vld [vmem:[%s509_s3 + $0x28] sm:$0xff]  ;;  %v26_v16 = vld [vmem:[%s510_s0] sm:$0xff]  ;;  %v119_v18 = vld [vmem:[%s509_s3 + $0x30] sm:$0xff] }
   0x5   :  { %371 = vmatprep.subr.bf16.mxu0 %v397_v0  ;;  %376 = vmatpush3.bf16.msra.mxu1 %v375_v12  ;;  %v381_v17 = vpack.c.bf16 %v118_v15, %v117_v14  ;;  %v120_v19 = vld [vmem:[%s509_s3 + $0x38] sm:$0xff]  ;;  %v203_v21 = vld [vmem:[%s511_s5] sm:$0xff]  ;;  %v204_v22 = vld [vmem:[%s511_s5 + $0x8] sm:$0xff]  ;;  %vm289_vm3 = vcmp.ge.s32.totalorder %v288_v44, 96 }
   0x6   :  { %377 = vmatprep.subr.bf16.mxu1 %v397_v0  ;;  %v384_v20 = vpack.c.bf16 %v120_v19, %v119_v18  ;;  %v387_v23 = vpack.c.bf16 %v204_v22, %v203_v21  ;;  %v302_v24 = vld [vmem:[%s512_s2] ss:$0 sm:$0xff]  ;;  %v205_v29 = vld [vmem:[%s511_s5 + $0x10] sm:$0xff]  ;;  %v206_v30 = vld [vmem:[%s511_s5 + $0x18] sm:$0xff] }
   0x7   :  { %v390_v31 = vpack.c.bf16 %v206_v30, %v205_v29  ;;  %v304_v32 = vld [vmem:[%s513_s4] ss:$0 sm:$0xff] }
   0x8   :  { %373 = vmatpush3.bf16.msra.mxu0 %v372_v11  ;;  %v306_v37 = vld [vmem:[%s514_s6] ss:$0 sm:$0xff] }
   0x9   :  { %386 = vmatprep.subr.bf16.mxu0 %v397_v0  ;;  %379 = vmatpush3.bf16.msra.mxu1 %v378_v13 }
   0xa   :  { %380 = vmatprep.subr.bf16.mxu1 %v397_v0 }
   0xb   :  { %336 = vmatmul.mubr.msk.f32.vlgmr.msra.gmra.mrb[0].mxu0 %vm38_vm1, %v26_v16 }
   0xc   :  { %365 = vmatprep.mubr.msk.f32.mxu0 %vm398_vm0, %v399_v4  ;;  %388 = vmatpush3.bf16.msra.mxu0 %v387_v23 }
   0xd   :  { %382 = vmatpush3.bf16.msra.mxu1 %v381_v17  ;;  %389 = vmatprep.subr.bf16.mxu0 %v397_v0 }
   0xe   :  { %383 = vmatprep.subr.bf16.mxu1 %v397_v0 }
  0x10   :  { %391 = vmatpush3.bf16.msra.mxu0 %v390_v31 }
  0x11   :  { %385 = vmatpush3.bf16.msra.mxu1 %v384_v20 }
  0xde   :  { %v108_v25 = vpop.f32.mrb[0].mxu0 }
  0xdf   :  { %v109_v26 = vadd.f32 %v302_v24, %v108_v25  ;;  %v337_v27 = vpop.f32.mrb[1].mxu0 }
  0xe1   :  { %v112_v28 = vmax.f32 %v109_v26, 0.0 }
  0xe3   :  { %355 = vmatmul.mubr.msk.f32.vlgmr.msra.gmra.mrb[0].mxu1 %vm128_vm2, %v112_v28 }
 0x1b6   :  { %v198_v33 = vpop.f32.mrb[0].mxu1 }
 0x1b7   :  { %v199_v34 = vadd.f32 %v304_v32, %v198_v33  ;;  %v356_v35 = vpop.f32.mrb[1].mxu1 }
 0x1b9   :  { %v202_v36 = vmax.f32 %v199_v34, 0.0 }
 0x1bb   :  { %366 = vmatmul.mubr.msk.f32.vlgmr.msra.gmra.mrb[2].mxu0 %vm38_vm1, %v202_v36 }
 0x28e   :  { %v283_v38 = vpop.f32.mrb[2].mxu0 }
 0x28f   :  { %v284_v39 = vadd.f32 %v306_v37, %v283_v38  ;;  %v367_v40 = vpop.f32.mrb[3].mxu0 }
 0x291   :  { %v292_v41 = vmul.f32 %v284_v39, %v284_v39 }
 0x293   :  { %v293_v42 = vadd.f32 1e-08, %v292_v41 }
 0x295   :  { %395 = vlog2.f32 %v293_v42 }
 0x29f   :  { %v396_v45 = vpop.eup %395 }
 0x2a0   :  { %v295_v46 = vmul.f32 0.6931472, %v396_v45 }
 0x2a2   :  { %v296_v47 = vsel %vm289_vm3, %v295_v46, %v284_v39 }
 0x2a3   :  { %297 = vst [vmem:[%s515_s7] sm:$0xff] %v296_v47 }

</bundles_post_ra>
